<compile_context>
chip_gen: v7x
topology: tpu7x:2x2x1
jax: 0.10.0
libtpu: 0.0.40
codegen_flags: <defaults>
</compile_context>

<pallas_src>
import jax
import jax.numpy as jnp
from jax import lax
from jax.experimental import pallas as pl
from jax.experimental.pallas import tpu as pltpu

EPS = 1e-5  # nn.LayerNorm default


def _patch_embed_ln_kernel(x_ref, w_ref, b_ref, o_ref):
    """Fused flatten/transpose + LayerNorm over C for one (batch, spatial) tile.

    x_ref: (1, C, TS) slab of the NCHW input (C on sublanes, spatial on lanes)
    w_ref, b_ref: (C, 1) LayerNorm affine parameters (resident across the grid)
    o_ref: (1, TS, C) slab of (B, HW, C)                [plain layout]
           or (1, TS*C/128, 128) packed lane-dense slab  [packed layout]
    """
    x = x_ref[0].astype(jnp.float32)                    # (C, TS), lane-dense
    inv_c = 1.0 / x.shape[0]
    mean = jnp.sum(x, axis=0, keepdims=True) * inv_c     # (1, TS)
    xc = x - mean                                        # two-pass: subtract first
    var = jnp.sum(xc * xc, axis=0, keepdims=True) * inv_c
    inv = lax.rsqrt(var + EPS)                           # EUP rsqrt

    w = w_ref[...].astype(jnp.float32)                   # (C, 1), broadcasts over lanes
    b = b_ref[...].astype(jnp.float32)
    y = xc * inv * w + b                                 # (C, TS), lane-dense VPU work

    yt = jnp.transpose(y)                                # (TS, C) -- XLU
    tgt = tuple(o_ref.shape)[1:]
    if yt.shape != tgt:
        # Packed layout: repack to (TS*C/128, 128) so every store is a full-lane vst
        # and the writeback DMA is dense.
        yt = yt.reshape(tgt)
    o_ref[0] = yt.astype(o_ref.dtype)


def _vmem_limit_bytes():
    """Chip-aware VMEM request: <= 3/4 of capacity, capped (v7x has only 64 MiB/TC)."""
    cap = 64 * 1024 * 1024
    try:
        cap = int(pltpu.get_tpu_info().vmem_capacity_bytes)
    except Exception:
        pass  # conservative (v7x-sized) default
    return min((cap * 3) // 4, 96 * 1024 * 1024)


def _choose_spatial_tile(B, C, HW, itemsize, vmem_limit):
    """Largest lane-aligned spatial tile that fits the VMEM budget.

    Budget model (bytes per spatial position):
      2x double-buffered input block  : 2 * C * itemsize
      2x double-buffered output block : 2 * max(C, 128) * itemsize  (covers the
                                        lane-padded fallback layout)
      ~6 full-tile f32 intermediates  : 6 * C * 4
      lane-padded transposed f32 temp : max(C, 128) * 4
    """
    per_pos = (2 * C + 2 * max(C, 128)) * itemsize + (6 * C + max(C, 128)) * 4
    budget = (vmem_limit * 3) // 4
    ts = min(int(budget // per_pos), 16384)
    if ts >= HW:
        ts = HW                                     # a single tile covers the image
    else:
        ts = max(128, (ts // 128) * 128)            # lane-aligned partial tiles
    # v7x megacore: guarantee >= 2 parallel grid steps when possible.
    if B * (-(-HW // ts)) < 2 and HW > 128:
        ts = ((HW + 1) // 2 + 127) // 128 * 128
    return ts


def _ln_pallas_call(x3, w2, b2, *, ts, packed, vmem_limit):
    """x3: (B, C, HW) NCHW-major -> LayerNorm(C), laid out per `packed`."""
    B, C, HW = x3.shape
    n_spatial = -(-HW // ts)

    in_specs = [
        pl.BlockSpec((1, C, ts), lambda bb, ss: (bb, 0, ss)),   # NCHW slab (lane-dense)
        pl.BlockSpec((C, 1), lambda bb, ss: (0, 0)),            # gamma (resident)
        pl.BlockSpec((C, 1), lambda bb, ss: (0, 0)),            # beta  (resident)
    ]
    if packed:
        out_shape = jax.ShapeDtypeStruct((B, (HW * C) // 128, 128), x3.dtype)
        out_specs = pl.BlockSpec((1, (ts * C) // 128, 128), lambda bb, ss: (bb, ss, 0))
    else:
        out_shape = jax.ShapeDtypeStruct((B, HW, C), x3.dtype)
        out_specs = pl.BlockSpec((1, ts, C), lambda bb, ss: (bb, ss, 0))

    return pl.pallas_call(
        _patch_embed_ln_kernel,
        out_shape=out_shape,
        grid_spec=pltpu.PrefetchScalarGridSpec(
            num_scalar_prefetch=0,
            grid=(B, n_spatial),
            in_specs=in_specs,
            out_specs=out_specs,
        ),
        compiler_params=pltpu.CompilerParams(
            dimension_semantics=("parallel", "parallel"),
            vmem_limit_bytes=int(vmem_limit),
        ),
    )(x3, w2, b2)


def _fused_flatten_layernorm(x3, weight, bias, *, spatial_tile=None, pack_output=None):
    B, C, HW = x3.shape
    w2 = weight.reshape(C, 1)
    b2 = bias.reshape(C, 1)

    vmem_limit = _vmem_limit_bytes()
    if spatial_tile is None:
        ts = _choose_spatial_tile(B, C, HW, x3.dtype.itemsize, vmem_limit)
    else:
        ts = min(int(spatial_tile), HW)
        if ts < HW:
            ts = max(128, (ts // 128) * 128)

    can_pack = (HW * C) % 128 == 0
    if pack_output is None:
        pack_output = can_pack

    if pack_output and can_pack:
        try:
            out = _ln_pallas_call(x3, w2, b2, ts=ts, packed=True, vmem_limit=vmem_limit)
            return out.reshape(B, HW, C)      # free reshape of the packed slab
        except Exception:
            # This Mosaic version cannot lower the lane-merging repack; fall back to
            # the plain (TS, C) store layout (correct, just masked sub-128-lane stores).
            pass
    return _ln_pallas_call(x3, w2, b2, ts=ts, packed=False, vmem_limit=vmem_limit)


def patch_embed_forward(x, weight=None, bias=None, *, use_norm=True,
                        spatial_tile=None, pack_output=None):
    """PatchEmbed.forward: (B, C, H, W) NCHW -> (B, H*W, C), optional LayerNorm(C)."""
    B, C, H, W = x.shape
    x3 = x.reshape(B, C, H * W)               # free reshape, stays NCHW-major in HBM
    if not use_norm:
        # norm_layer=None path: pure layout op (flatten + transpose), leave to XLA.
        return jnp.transpose(x3, (0, 2, 1))
    return _fused_flatten_layernorm(x3, weight, bias,
                                    spatial_tile=spatial_tile, pack_output=pack_output)


def _reference(x, weight, bias):
    B, C, H, W = x.shape
    xr = jnp.transpose(x.reshape(B, C, H * W), (0, 2, 1))
    mean = jnp.mean(xr, axis=-1, keepdims=True)
    var = jnp.mean((xr - mean) ** 2, axis=-1, keepdims=True)
    return (xr - mean) / jnp.sqrt(var + EPS) * weight + bias


if __name__ == "__main__":
    # SwinIR's PatchEmbed operates on a feature map whose channel count equals
    # embed_dim (no conv projection inside forward): small demo shapes.
    B, C, H, W = 2, 32, 16, 16               # embed_dim = 32, num_patches = 256

    key = jax.random.PRNGKey(0)
    kx, kw, kb = jax.random.split(key, 3)
    x = jax.random.normal(kx, (B, C, H, W), dtype=jnp.float32)
    weight = 1.0 + 0.1 * jax.random.normal(kw, (C,), dtype=jnp.float32)
    bias = 0.1 * jax.random.normal(kb, (C,), dtype=jnp.float32)

    ref = _reference(x, weight, bias)

    # 1) Default config: auto tile size, lane-dense packed output (with fallback).
    out = jax.block_until_ready(patch_embed_forward(x, weight, bias))
    assert out.shape == (B, H * W, C)
    assert float(jnp.max(jnp.abs(out - ref))) < 1e-4

    # 2) Plain (TS, C) store layout, explicitly.
    out_plain = jax.block_until_ready(
        patch_embed_forward(x, weight, bias, pack_output=False))
    assert float(jnp.max(jnp.abs(out_plain - ref))) < 1e-4

    # 3) Small spatial tile with a ragged final tile: exercises the multi-step grid
    #    and Pallas boundary masking (HW = 400 = 3*128 + 16 positions).
    H2 = W2 = 20
    x2 = jax.random.normal(kx, (1, C, H2, W2), dtype=jnp.float32)
    ref2 = _reference(x2, weight, bias)
    out2 = jax.block_until_ready(
        patch_embed_forward(x2, weight, bias, spatial_tile=128))
    assert out2.shape == (1, H2 * W2, C)
    assert float(jnp.max(jnp.abs(out2 - ref2))) < 1e-4

    # 4) norm_layer=None path (pure flatten + transpose).
    ref_nonorm = jnp.transpose(x.reshape(B, C, H * W), (0, 2, 1))
    out_nonorm = jax.block_until_ready(patch_embed_forward(x, use_norm=False))
    assert float(jnp.max(jnp.abs(out_nonorm - ref_nonorm))) == 0.0

    print("KERNEL_OK")
</pallas_src>

<mosaic_0001>
module attributes {stable_mosaic.version = 11 : i64} {
  func.func @_patch_embed_ln_kernel(%arg0: i32, %arg1: i32, %arg2: memref<1x32x256xf32, #tpu.memory_space<vmem>>, %arg3: memref<32x1xf32, #tpu.memory_space<vmem>>, %arg4: memref<32x1xf32, #tpu.memory_space<vmem>>, %arg5: memref<1x64x128xf32, #tpu.memory_space<vmem>>) attributes {dimension_semantics = [#tpu.dimension_semantics<parallel>, #tpu.dimension_semantics<parallel>], iteration_bounds = array<i64: 2, 1>, scalar_prefetch = 0 : i64, scratch_operands = 0 : i64, tpu.core_type = #tpu.core_type<tc>, window_params = [{transform_indices = @transform_0, window_bounds = array<i64: 1, 32, 256>}, {pipeline_mode = #tpu.pipeline_mode<synchronous>, transform_indices = @transform_1, window_bounds = array<i64: 32, 1>}, {pipeline_mode = #tpu.pipeline_mode<synchronous>, transform_indices = @transform_2, window_bounds = array<i64: 32, 1>}, {transform_indices = @transform_3, window_bounds = array<i64: 1, 64, 128>}]} {
    %c0 = arith.constant 0 : index
    %c0_0 = arith.constant 0 : index
    %c0_1 = arith.constant 0 : index
    %0 = vector.load %arg2[%c0, %c0_0, %c0_1] : memref<1x32x256xf32, #tpu.memory_space<vmem>>, vector<1x32x256xf32>
    %1 = vector.shape_cast %0 : vector<1x32x256xf32> to vector<32x256xf32>
    %cst = arith.constant dense<0.000000e+00> : vector<256xf32>
    %2 = vector.multi_reduction <add>, %1, %cst [0] : vector<32x256xf32> to vector<256xf32>
    %3 = vector.shape_cast %2 : vector<256xf32> to vector<1x256xf32>
    %cst_2 = arith.constant 3.125000e-02 : f32
    %4 = vector.broadcast %cst_2 : f32 to vector<1x256xf32>
    %5 = arith.mulf %3, %4 : vector<1x256xf32>
    %6 = vector.broadcast %5 : vector<1x256xf32> to vector<32x256xf32>
    %7 = arith.subf %1, %6 : vector<32x256xf32>
    %8 = arith.mulf %7, %7 : vector<32x256xf32>
    %cst_3 = arith.constant dense<0.000000e+00> : vector<256xf32>
    %9 = vector.multi_reduction <add>, %8, %cst_3 [0] : vector<32x256xf32> to vector<256xf32>
    %10 = vector.shape_cast %9 : vector<256xf32> to vector<1x256xf32>
    %cst_4 = arith.constant 3.125000e-02 : f32
    %11 = vector.broadcast %cst_4 : f32 to vector<1x256xf32>
    %12 = arith.mulf %10, %11 : vector<1x256xf32>
    %cst_5 = arith.constant 9.99999974E-6 : f32
    %13 = vector.broadcast %cst_5 : f32 to vector<1x256xf32>
    %14 = arith.addf %12, %13 : vector<1x256xf32>
    %15 = math.rsqrt %14 : vector<1x256xf32>
    %c0_6 = arith.constant 0 : index
    %c0_7 = arith.constant 0 : index
    %16 = vector.load %arg3[%c0_6, %c0_7] : memref<32x1xf32, #tpu.memory_space<vmem>>, vector<32x1xf32>
    %c0_8 = arith.constant 0 : index
    %c0_9 = arith.constant 0 : index
    %17 = vector.load %arg4[%c0_8, %c0_9] : memref<32x1xf32, #tpu.memory_space<vmem>>, vector<32x1xf32>
    %18 = vector.broadcast %15 : vector<1x256xf32> to vector<32x256xf32>
    %19 = arith.mulf %7, %18 : vector<32x256xf32>
    %20 = vector.broadcast %16 : vector<32x1xf32> to vector<32x256xf32>
    %21 = arith.mulf %19, %20 : vector<32x256xf32>
    %22 = vector.broadcast %17 : vector<32x1xf32> to vector<32x256xf32>
    %23 = arith.addf %21, %22 : vector<32x256xf32>
    %24 = tpu.transpose %23, [1, 0] : vector<32x256xf32> -> vector<256x32xf32>
    %25 = vector.shape_cast %24 : vector<256x32xf32> to vector<64x128xf32>
    %c0_10 = arith.constant 0 : index
    %c0_11 = arith.constant 0 : index
    %c0_12 = arith.constant 0 : index
    %26 = vector.load %arg5[%c0_10, %c0_11, %c0_12] : memref<1x64x128xf32, #tpu.memory_space<vmem>>, vector<1x64x128xf32>
    %27 = vector.shape_cast %26 : vector<1x64x128xf32> to vector<64x128xf32>
    %28 = vector.shape_cast %25 : vector<64x128xf32> to vector<1x64x128xf32>
    tpu.vector_store %arg5[%c0_10, %c0_11, %c0_12], %28 {strides = array<i32>} : memref<1x64x128xf32, #tpu.memory_space<vmem>>, vector<1x64x128xf32>,
    return
  }
  func.func @transform_0(%arg0: i32, %arg1: i32) -> (i32, i32, i32) {
    %c0_i32 = arith.constant 0 : i32
    %c0_i32_0 = arith.constant 0 : i32
    return %arg0, %c0_i32, %arg1 : i32, i32, i32
  }
  func.func @transform_1(%arg0: i32, %arg1: i32) -> (i32, i32) {
    %c0_i32 = arith.constant 0 : i32
    %c0_i32_0 = arith.constant 0 : i32
    %c0_i32_1 = arith.constant 0 : i32
    return %c0_i32, %c0_i32_0 : i32, i32
  }
  func.func @transform_2(%arg0: i32, %arg1: i32) -> (i32, i32) {
    %c0_i32 = arith.constant 0 : i32
    %c0_i32_0 = arith.constant 0 : i32
    %c0_i32_1 = arith.constant 0 : i32
    return %c0_i32, %c0_i32_0 : i32, i32
  }
  func.func @transform_3(%arg0: i32, %arg1: i32) -> (i32, i32, i32) {
    %c0_i32 = arith.constant 0 : i32
    %c0_i32_0 = arith.constant 0 : i32
    return %arg0, %arg1, %c0_i32 : i32, i32, i32
  }
}

module attributes {stable_mosaic.version = 11 : i64} {
  func.func @_patch_embed_ln_kernel(%arg0: i32, %arg1: i32, %arg2: memref<1x32x256xf32, #tpu.memory_space<vmem>>, %arg3: memref<32x1xf32, #tpu.memory_space<vmem>>, %arg4: memref<32x1xf32, #tpu.memory_space<vmem>>, %arg5: memref<1x256x32xf32, #tpu.memory_space<vmem>>) attributes {dimension_semantics = [#tpu.dimension_semantics<parallel>, #tpu.dimension_semantics<parallel>], iteration_bounds = array<i64: 2, 1>, scalar_prefetch = 0 : i64, scratch_operands = 0 : i64, tpu.core_type = #tpu.core_type<tc>, window_params = [{transform_indices = @transform_0, window_bounds = array<i64: 1, 32, 256>}, {pipeline_mode = #tpu.pipeline_mode<synchronous>, transform_indices = @transform_1, window_bounds = array<i64: 32, 1>}, {pipeline_mode = #tpu.pipeline_mode<synchronous>, transform_indices = @transform_2, window_bounds = array<i64: 32, 1>}, {transform_indices = @transform_3, window_bounds = array<i64: 1, 256, 32>}]} {
    %c0 = arith.constant 0 : index
    %c0_0 = arith.constant 0 : index
    %c0_1 = arith.constant 0 : index
    %0 = vector.load %arg2[%c0, %c0_0, %c0_1] : memref<1x32x256xf32, #tpu.memory_space<vmem>>, vector<1x32x256xf32>
    %1 = vector.shape_cast %0 : vector<1x32x256xf32> to vector<32x256xf32>
    %cst = arith.constant dense<0.000000e+00> : vector<256xf32>
    %2 = vector.multi_reduction <add>, %1, %cst [0] : vector<32x256xf32> to vector<256xf32>
    %3 = vector.shape_cast %2 : vector<256xf32> to vector<1x256xf32>
    %cst_2 = arith.constant 3.125000e-02 : f32
    %4 = vector.broadcast %cst_2 : f32 to vector<1x256xf32>
    %5 = arith.mulf %3, %4 : vector<1x256xf32>
    %6 = vector.broadcast %5 : vector<1x256xf32> to vector<32x256xf32>
    %7 = arith.subf %1, %6 : vector<32x256xf32>
    %8 = arith.mulf %7, %7 : vector<32x256xf32>
    %cst_3 = arith.constant dense<0.000000e+00> : vector<256xf32>
    %9 = vector.multi_reduction <add>, %8, %cst_3 [0] : vector<32x256xf32> to vector<256xf32>
    %10 = vector.shape_cast %9 : vector<256xf32> to vector<1x256xf32>
    %cst_4 = arith.constant 3.125000e-02 : f32
    %11 = vector.broadcast %cst_4 : f32 to vector<1x256xf32>
    %12 = arith.mulf %10, %11 : vector<1x256xf32>
    %cst_5 = arith.constant 9.99999974E-6 : f32
    %13 = vector.broadcast %cst_5 : f32 to vector<1x256xf32>
    %14 = arith.addf %12, %13 : vector<1x256xf32>
    %15 = math.rsqrt %14 : vector<1x256xf32>
    %c0_6 = arith.constant 0 : index
    %c0_7 = arith.constant 0 : index
    %16 = vector.load %arg3[%c0_6, %c0_7] : memref<32x1xf32, #tpu.memory_space<vmem>>, vector<32x1xf32>
    %c0_8 = arith.constant 0 : index
    %c0_9 = arith.constant 0 : index
    %17 = vector.load %arg4[%c0_8, %c0_9] : memref<32x1xf32, #tpu.memory_space<vmem>>, vector<32x1xf32>
    %18 = vector.broadcast %15 : vector<1x256xf32> to vector<32x256xf32>
    %19 = arith.mulf %7, %18 : vector<32x256xf32>
    %20 = vector.broadcast %16 : vector<32x1xf32> to vector<32x256xf32>
    %21 = arith.mulf %19, %20 : vector<32x256xf32>
    %22 = vector.broadcast %17 : vector<32x1xf32> to vector<32x256xf32>
    %23 = arith.addf %21, %22 : vector<32x256xf32>
    %24 = tpu.transpose %23, [1, 0] : vector<32x256xf32> -> vector<256x32xf32>
    %c0_10 = arith.constant 0 : index
    %c0_11 = arith.constant 0 : index
    %c0_12 = arith.constant 0 : index
    %25 = vector.load %arg5[%c0_10, %c0_11, %c0_12] : memref<1x256x32xf32, #tpu.memory_space<vmem>>, vector<1x256x32xf32>
    %26 = vector.shape_cast %25 : vector<1x256x32xf32> to vector<256x32xf32>
    %27 = vector.shape_cast %24 : vector<256x32xf32> to vector<1x256x32xf32>
    tpu.vector_store %arg5[%c0_10, %c0_11, %c0_12], %27 {strides = array<i32>} : memref<1x256x32xf32, #tpu.memory_space<vmem>>, vector<1x256x32xf32>,
    return
  }
  func.func @transform_0(%arg0: i32, %arg1: i32) -> (i32, i32, i32) {
    %c0_i32 = arith.constant 0 : i32
    %c0_i32_0 = arith.constant 0 : i32
    return %arg0, %c0_i32, %arg1 : i32, i32, i32
  }
  func.func @transform_1(%arg0: i32, %arg1: i32) -> (i32, i32) {
    %c0_i32 = arith.constant 0 : i32
    %c0_i32_0 = arith.constant 0 : i32
    %c0_i32_1 = arith.constant 0 : i32
    return %c0_i32, %c0_i32_0 : i32, i32
  }
  func.func @transform_2(%arg0: i32, %arg1: i32) -> (i32, i32) {
    %c0_i32 = arith.constant 0 : i32
    %c0_i32_0 = arith.constant 0 : i32
    %c0_i32_1 = arith.constant 0 : i32
    return %c0_i32, %c0_i32_0 : i32, i32
  }
  func.func @transform_3(%arg0: i32, %arg1: i32) -> (i32, i32, i32) {
    %c0_i32 = arith.constant 0 : i32
    %c0_i32_0 = arith.constant 0 : i32
    return %arg0, %arg1, %c0_i32 : i32, i32, i32
  }
}

</mosaic_0001>

<bundles_post_ra>
// kernel: tpu_custom_call.1
= control target key start
LH: loop header
LB: loop body
LE: loop exit
PB: predicated region body
PF: predicated region fallthrough
CT: control target
= control target key end

     0   :  { %8 = vsyncpa [#allocation3], 0  ;;  %s961_s0 = inlined_call_operand.hbm [shape: f32[2,32,256], index: 0, kind: input, shape index: {}]   ;;  %s962_s1 = inlined_call_operand.vmem [shape: f32[32,1], index: 1, kind: input, shape index: {}]   ;;  %s963_s2 = inlined_call_operand.vmem [shape: f32[32,1], index: 2, kind: input, shape index: {}]   ;;  %s964_s3 = inlined_call_operand.vmem [shape: f32[2,256,32], index: 3, kind: output, shape index: {}]  }
   0x1   :  { %10 = vsyncpa [#allocation3 + $0x1], 0  ;;  %s737_s12 = smov 0   ;;  %s739_s13 = smov 0  }
   0x2   :  { %s741_s14 = smov 0   ;;  %s743_s15 = smov 0  }
   0x3   :  { %s745_s16 = smov 0   ;;  %s747_s17 = smov 0  }
   0x4 LB: > { %s551_s18 = sadd.s32 4294967295, %s711_s17   ;;  %s28_s19 = sadd.s32 1, %s707_s16  ;;  %s711_s17 = sphi %s747_s17, %s16_s17   ;;  %s707_s16 = sphi %s745_s16, %s972_s16   ;;  %s703_s15 = sphi %s743_s15, %s971_s15   ;;  %s699_s14 = sphi %s741_s14, %s970_s14   ;;  %s695_s13 = sphi %s739_s13, %s969_s13   ;;  %s691_s12 = sphi %s737_s12, %s968_s12  }
   0x5   : > { %p30_p0 = scmp.ge.s32.totalorder %s28_s19, 2  ;;  %s37_s20 = sadd.s32 1, %s699_s14 }
   0x6   : > { %p44_p1 = scmp.ne.s32.totalorder %s699_s14, %s695_s13  ;;  %p45_p2 = scmp.eq.s32.totalorder %s711_s17, 0 }
   0x7   : > { %s974_s19 = smov (%p30_p0, %s28_s19), 0  ;;  %p50_p4 = scmp.ne.s32.totalorder %s695_s13, %s691_s12 }
   0x8   : > { %p773_p3 = por %p45_p2, %p44_p1  ;;  %s32_s22 = ssub.s32 %s707_s16, %s974_s19 }
   0x9   : > { %p51_p5 = scmp.eq.s32.totalorder %s551_s18, 0  ;;  %p35_p6 = scmp.eq.s32.totalorder %s32_s22, 0 }
   0xa   : > { %p572_p8 = scmp.lt.s32.totalorder %s711_s17, 2  ;;  %s150_s25 = sand.u32 1, %s699_s14  }
   0xb   : > { %p780_p7 = por %p51_p5, %p50_p4  ;;  %s564_s26 = sshll.u32 %s707_s16, 10 }
   0xc   : > { %s786_s24 = scalar_select %p35_p6, %s699_s14, %s37_s20  }
   0xd   : > { %s555_s27 = sshll.u32 %s150_s25, 6  ;;  %s793_s30 = scalar_lea.hbm %s961_s0, %s564_s26 }
   0xe   : > { %s154_s4 = scalar_lea.vmem [#allocation2], %s555_s27  ;;  %p797_p9 = pnand %p572_p8, %p773_p3 }
   0xf   : > { %s163_s5 = sshll.u32 %s154_s4, 4  ;;  %s803_s7 = scalar_lea.sflag [#allocation3], %s150_s25  ;;  %s801_s5 = int_to_ptr.vmem [resolvable:$true] %s163_s5 }
  0x10   : > { %s631_s8 = scalar_lea.hbm %s793_s30, 1024  ;;  %p633_p11 = pneg %p797_p9 }
  0x11   : > { %p632_p10 = scmp.ne.s32.totalorder %s793_s30, %s631_s8  ;;  %s636_s11 = scalar_lea.hbm %s961_s0, 2048 }
  0x12   : > { %p637_p0 = scmp.lt.u32.totalorder %s793_s30, %s961_s0  ;;  %p638_p1 = scmp.lt.u32.totalorder %s636_s11, %s631_s8 }
  0x13   : > { %p634_p12 = pnand %p633_p11, %p632_p10  ;;  %p640_p3 = scmp.lt.u32.totalorder %s631_s8, %s793_s30 }
  0x14   : > { %p639_p2 = por %p638_p1, %p637_p0 }
  0x15   : > { %p635_p13 = pneg %p634_p12 }
  0x16   : > { %p641_p4 = por %p640_p3, %p639_p2 }
  0x18   : > { %p642_p5 = pnand %p641_p4, %p635_p13 }
  0x1a   : > { %645 = shalt.err (!%p642_p5)
}
  0x1b   : > { %s646_s20 = scalar_lea.vmem %s801_s5, 1024  ;;  %s713_s21 = smov [#allocation2]  }
  0x1c   : > { %p647_p6 = scmp.ne.s32.totalorder %s801_s5, %s646_s20  ;;  %s651_s22 = sshll.u32 %s713_s21, 4  ;;  %s652_s22 = int_to_ptr.vmem [resolvable:$false] %s651_s22 }
  0x1d   : > { %s653_s25 = scalar_lea.vmem %s652_s22, 2048  ;;  %p654_p12 = scmp.lt.s32.totalorder %s801_s5, %s652_s22 }
  0x1e   : > { %p649_p8 = pnand %p647_p6, %p633_p11  ;;  %p655_p0 = scmp.lt.s32.totalorder %s653_s25, %s646_s20 }
  0x20   : > { %p650_p10 = pneg %p649_p8  ;;  %p656_p1 = por %p655_p0, %p654_p12 }
  0x22   : > { %p657_p2 = pnand %p656_p1, %p650_p10 }
  0x24   : > { %660 = shalt.err (!%p657_p2)
}
  0x25   : > { %s714_s26 = smov 256   ;;  %s715_s27 = smov 16  }
  0x26   : > { %571 = dma.hbm_to_vmem [thread:$0]  (!%p797_p9), %s793_s30, 1024, %s801_s5, %s803_s7, %s714_s26, %s714_s26, %s715_s27  }
  0x27   : > { %p558_p11 = scmp.ge.s32.totalorder %s711_s17, 1  ;;  %p171_p13 = scmp.lt.s32.totalorder %s711_s17, 3 }
  0x29   : > { %p172_p3 = pnand %p558_p11, %p171_p13 }
  0x2a   : > { %s177_s28 = sand.u32 (!%p172_p3), 1, %s695_s13  }
  0x2b   : > { %175 = sbr.rel (%p172_p3) target bundleno = 377 (0x179), region = 32  ;;  %s559_s29 = sshll.u32 (!%p172_p3), %s177_s28, 6 }
  0x2c   : > { %s178_s4 = scalar_lea.sflag (!%p172_p3), [#allocation3], %s177_s28  ;;  %s834_s8 = scalar_lea.vmem (!%p172_p3), [#allocation2], %s559_s29 }
  0x32   : > { %686 = dma.done.wait (%p780_p7), %s178_s4, 1024  }
  0x33   : > { %688 = vsyncadd (%p780_p7), %s178_s4, 4294966272  ;;  %v716_v0 = vmov 0   ;;  %v291_v1 = vld [vmem:[%s963_s2] sm:$0xff]  ;;  %v289_v3 = vld [vmem:[%s962_s1 + $0x10] sm:$0xff]  ;;  %p210_p7 = scmp.lt.s32.totalorder %s703_s15, 1  ;;  %vm423_vm0 = vcmask 261120  }
  0x34   : > { %626 = vset.pattern.permute.xlu1 %v716_v0  ;;  %625 = vset.pattern.permute.xlu0 %v716_v0  ;;  %v287_v2 = vld [vmem:[%s962_s1] sm:$0xff]  ;;  %v288_v4 = vld [vmem:[%s962_s1 + $0x8] sm:$0xff]  ;;  %v290_v5 = vld [vmem:[%s962_s1 + $0x18] sm:$0xff] }
  0x35   : > { %333 = vperm.xlu1 %626, %v291_v1   ;;  %305 = vperm.xlu0 %625, %v287_v2   ;;  %v292_v6 = vld [vmem:[%s963_s2 + $0x8] sm:$0xff]  ;;  %v294_v7 = vld [vmem:[%s963_s2 + $0x18] sm:$0xff]  ;;  %v293_v8 = vld [vmem:[%s963_s2 + $0x10] sm:$0xff]  ;;  %s976_s15 = smov (!%p210_p7, %s703_s15), 1 }
  0x36   : > { %v219_v9 = vld [vmem:[%s834_s8] sm:$0xff]  ;;  %v221_v10 = vld [vmem:[%s834_s8 + $0x10] sm:$0xff]  ;;  %v220_v11 = vld [vmem:[%s834_s8 + $0x8] sm:$0xff]  ;;  %s565_s28 = sshll.u32 %s976_s15, 8 }
  0x37   : > { %v222_v12 = vld [vmem:[%s834_s8 + $0x18] sm:$0xff]  ;;  %v227_v13 = vadd.f32 %v221_v10, %v219_v9  ;;  %v223_v14 = vld [vmem:[%s834_s8 + $0x20] sm:$0xff]  ;;  %v224_v16 = vld [vmem:[%s834_s8 + $0x28] sm:$0xff] }
  0x38   : > { %v236_v15 = vadd.f32 %v222_v12, %v220_v11  ;;  %v225_v18 = vld [vmem:[%s834_s8 + $0x30] sm:$0xff]  ;;  %v226_v20 = vld [vmem:[%s834_s8 + $0x38] sm:$0xff]  ;;  %s877_s8 = scalar_lea.vmem %s964_s3, %s565_s28 }
  0x39   : > { %315 = vperm.xlu1 %626, %v289_v3   ;;  %310 = vperm.xlu0 %625, %v288_v4   ;;  %v228_v17 = vadd.f32 %v227_v13, %v223_v14 }
  0x3a   : > { %v237_v19 = vadd.f32 %v236_v15, %v224_v16 }
  0x3b   : > { %v229_v21 = vadd.f32 %v228_v17, %v225_v18 }
  0x3c   : > { %v238_v22 = vadd.f32 %v237_v19, %v226_v20 }
  0x3d   : > { %320 = vperm.xlu1 %626, %v290_v5   ;;  %338 = vperm.xlu0 %625, %v292_v6   ;;  %v230_v23 = vrot.slane %v229_v21, 4 }
  0x3e   : > { %v239_v24 = vrot.slane %v238_v22, 4 }
  0x3f   : > { %v231_v25 = vadd.f32 %v230_v23, %v229_v21 }
  0x40   : > { %v240_v26 = vadd.f32 %v239_v24, %v238_v22 }
  0x41   : > { %348 = vperm.xlu1 %626, %v294_v7   ;;  %343 = vperm.xlu0 %625, %v293_v8   ;;  %v232_v27 = vrot.slane %v231_v25, 2 }
  0x42   : > { %v241_v28 = vrot.slane %v240_v26, 2 }
  0x43   : > { %v233_v29 = vadd.f32 %v232_v27, %v231_v25 }
  0x44   : > { %v242_v30 = vadd.f32 %v241_v28, %v240_v26 }
  0x45   : > { %v234_v31 = vrot.slane %v233_v29, 1 }
  0x46   : > { %v243_v32 = vrot.slane %v242_v30, 1 }
  0x47   : > { %v235_v33 = vadd.f32 %v234_v31, %v233_v29 }
  0x48   : > { %v244_v34 = vadd.f32 %v243_v32, %v242_v30 }
  0x49   : > { %v245_v35 = vmul.f32 0.03125, %v235_v33 }
  0x4a   : > { %v246_v36 = vmul.f32 0.03125, %v244_v34 }
  0x4b   : > { %v247_v37 = vsub.f32 %v219_v9, %v245_v35  ;;  %v249_v38 = vsub.f32 %v221_v10, %v245_v35  ;;  %v251_v41 = vsub.f32 %v223_v14, %v245_v35  ;;  %v253_v47 = vsub.f32 %v225_v18, %v245_v35 }
  0x4c   : > { %v248_v39 = vsub.f32 %v220_v11, %v246_v36  ;;  %v250_v40 = vsub.f32 %v222_v12, %v246_v36  ;;  %v252_v44 = vsub.f32 %v224_v16, %v246_v36  ;;  %v254_v50 = vsub.f32 %v226_v20, %v246_v36 }
  0x4d   : > { %v255_v42 = vmul.f32 %v247_v37, %v247_v37  ;;  %v257_v43 = vmul.f32 %v249_v38, %v249_v38  ;;  %v259_v48 = vmul.f32 %v251_v41, %v251_v41  ;;  %v261_v53 = vmul.f32 %v253_v47, %v253_v47 }
  0x4e   : > { %v256_v45 = vmul.f32 %v248_v39, %v248_v39  ;;  %v258_v46 = vmul.f32 %v250_v40, %v250_v40  ;;  %v260_v51 = vmul.f32 %v252_v44, %v252_v44  ;;  %v262_v55 = vmul.f32 %v254_v50, %v254_v50 }
  0x4f   : > { %v263_v49 = vadd.f32 %v257_v43, %v255_v42 }
  0x50   : > { %v272_v52 = vadd.f32 %v258_v46, %v256_v45 }
  0x51   : > { %v264_v54 = vadd.f32 %v263_v49, %v259_v48 }
  0x52   : > { %v273_v56 = vadd.f32 %v272_v52, %v260_v51 }
  0x53   : > { %v265_v57 = vadd.f32 %v264_v54, %v261_v53 }
  0x54   : > { %v274_v58 = vadd.f32 %v273_v56, %v262_v55 }
  0x55   : > { %v266_v59 = vrot.slane %v265_v57, 4 }
  0x56   : > { %v275_v60 = vrot.slane %v274_v58, 4 }
  0x57   : > { %v267_v61 = vadd.f32 %v266_v59, %v265_v57 }
  0x58   : > { %v276_v62 = vadd.f32 %v275_v60, %v274_v58 }
  0x59   : > { %v268_v63 = vrot.slane %v267_v61, 2 }
  0x5a   : > { %v277_v0 = vrot.slane %v276_v62, 2 }
  0x5b   : > { %v269_v1 = vadd.f32 %v268_v63, %v267_v61 }
  0x5c   : > { %v278_v2 = vadd.f32 %v277_v0, %v276_v62 }
  0x5d   : > { %v270_v3 = vrot.slane %v269_v1, 1 }
  0x5e   : > { %v279_v4 = vrot.slane %v278_v2, 1 }
  0x5f   : > { %v271_v5 = vadd.f32 %v270_v3, %v269_v1 }
  0x60   : > { %v280_v6 = vadd.f32 %v279_v4, %v278_v2 }
  0x61   : > { %v281_v7 = vmul.f32 0.03125, %v271_v5 }
  0x62   : > { %v282_v8 = vmul.f32 0.03125, %v280_v6 }
  0x63   : > { %v283_v9 = vadd.f32 1e-05, %v281_v7 }
  0x64   : > { %v284_v10 = vadd.f32 1e-05, %v282_v8 }
  0x65   : > { %627 = vrsqrt.f32 %v283_v9 }
  0x66   : > { %629 = vrsqrt.f32 %v284_v10 }
  0x6f   : > { %v628_v11 = vpop.eup %627 }
  0x70   : > { %v630_v12 = vpop.eup %629  ;;  %v295_v13 = vmul.f32 %v628_v11, %v247_v37  ;;  %v297_v21 = vmul.f32 %v628_v11, %v249_v38  ;;  %v299_v25 = vmul.f32 %v628_v11, %v251_v41  ;;  %v301_v33 = vmul.f32 %v628_v11, %v253_v47 }
  0x71   : > { %v296_v14 = vmul.f32 %v630_v12, %v248_v39  ;;  %v298_v22 = vmul.f32 %v630_v12, %v250_v40  ;;  %v300_v26 = vmul.f32 %v630_v12, %v252_v44  ;;  %v302_v36 = vmul.f32 %v630_v12, %v254_v50 }
  0xb4   : > { %v334_v15 = vpop.permute.xlu1 %333  ;;  %v306_v16 = vpop.permute.xlu0 %305 }
  0xb5   : > { %v323_v17 = vmul.f32 %v306_v16, %v295_v13  ;;  %v324_v18 = vmul.f32 %v306_v16, %v296_v14 }
  0xb7   : > { %v351_v19 = vadd.f32 %v334_v15, %v323_v17  ;;  %v352_v20 = vadd.f32 %v334_v15, %v324_v18 }
  0xb8   : > { %v316_v23 = vpop.permute.xlu1 %315  ;;  %v311_v24 = vpop.permute.xlu0 %310 }
  0xb9   : > { %391 = vxpose.xlu1.b32.start [1/4] (short) %v352_v20, 128  ;;  %359 = vxpose.xlu0.b32.start [1/4] (short) %v351_v19, 128  ;;  %v325_v27 = vmul.f32 %v311_v24, %v297_v21  ;;  %v326_v28 = vmul.f32 %v311_v24, %v298_v22  ;;  %v327_v34 = vmul.f32 %v316_v23, %v299_v25 }
  0xba   : > { %v328_v35 = vmul.f32 %v316_v23, %v300_v26 }
  0xbc   : > { %v321_v29 = vpop.permute.xlu1 %320  ;;  %v339_v30 = vpop.permute.xlu0 %338 }
  0xbd   : > { %v353_v31 = vadd.f32 %v339_v30, %v325_v27  ;;  %v354_v32 = vadd.f32 %v339_v30, %v326_v28  ;;  %v329_v41 = vmul.f32 %v321_v29, %v301_v33  ;;  %v330_v42 = vmul.f32 %v321_v29, %v302_v36 }
  0xbf   : > { %392 = vxpose.xlu1.b32.cont [2/4] (short) %v354_v32, 128  ;;  %360 = vxpose.xlu0.b32.cont [2/4] (short) %v353_v31, 128 }
  0xc0   : > { %v344_v37 = vpop.permute.xlu0 %343  ;;  %v349_v40 = vpop.permute.xlu1 %348 }
  0xc1   : > { %v355_v38 = vadd.f32 %v344_v37, %v327_v34  ;;  %v356_v39 = vadd.f32 %v344_v37, %v328_v35  ;;  %v357_v43 = vadd.f32 %v349_v40, %v329_v41  ;;  %v358_v44 = vadd.f32 %v349_v40, %v330_v42 }
  0xc3   : > { %393 = vxpose.xlu1.b32.cont [3/4] (short) %v356_v39, 128  ;;  %361 = vxpose.xlu0.b32.cont [3/4] (short) %v355_v38, 128 }
  0xc7   : > { %394 = vxpose.xlu1.b32.end [4/4] (short) %v358_v44, 128  ;;  %362 = vxpose.xlu0.b32.end [4/4] (short) %v357_v43, 128 }
 0x13b   : > { %v407_v45 = vpop.trf.xlu1  ;;  %v375_v46 = vpop.trf.xlu0 }
 0x13c   : > { %440 = vst.msk [vmem:[%s877_s8 + $0x80] sm:$0xff] %vm423_vm0, %v407_v45  ;;  %424 = vst.msk [vmem:[%s877_s8] sm:$0xff] %vm423_vm0, %v375_v46 }
 0x13f   : > { %v408_v47 = vpop.trf.xlu1  ;;  %v376_v48 = vpop.trf.xlu0 }
 0x140   : > { %441 = vst.msk [vmem:[%s877_s8 + $0x88] sm:$0xff] %vm423_vm0, %v408_v47  ;;  %425 = vst.msk [vmem:[%s877_s8 + $0x8] sm:$0xff] %vm423_vm0, %v376_v48 }
 0x143   : > { %v409_v49 = vpop.trf.xlu1  ;;  %v377_v50 = vpop.trf.xlu0 }
 0x144   : > { %442 = vst.msk [vmem:[%s877_s8 + $0x90] sm:$0xff] %vm423_vm0, %v409_v49  ;;  %426 = vst.msk [vmem:[%s877_s8 + $0x10] sm:$0xff] %vm423_vm0, %v377_v50 }
 0x147   : > { %v410_v51 = vpop.trf.xlu1  ;;  %v378_v52 = vpop.trf.xlu0 }
 0x148   : > { %443 = vst.msk [vmem:[%s877_s8 + $0x98] sm:$0xff] %vm423_vm0, %v410_v51  ;;  %427 = vst.msk [vmem:[%s877_s8 + $0x18] sm:$0xff] %vm423_vm0, %v378_v52 }
 0x14b   : > { %v411_v53 = vpop.trf.xlu1  ;;  %v379_v54 = vpop.trf.xlu0 }
 0x14c   : > { %444 = vst.msk [vmem:[%s877_s8 + $0xa0] sm:$0xff] %vm423_vm0, %v411_v53  ;;  %428 = vst.msk [vmem:[%s877_s8 + $0x20] sm:$0xff] %vm423_vm0, %v379_v54 }
 0x14f   : > { %v412_v55 = vpop.trf.xlu1  ;;  %v380_v56 = vpop.trf.xlu0 }
 0x150   : > { %445 = vst.msk [vmem:[%s877_s8 + $0xa8] sm:$0xff] %vm423_vm0, %v412_v55  ;;  %429 = vst.msk [vmem:[%s877_s8 + $0x28] sm:$0xff] %vm423_vm0, %v380_v56 }
 0x153   : > { %v413_v57 = vpop.trf.xlu1  ;;  %v381_v58 = vpop.trf.xlu0 }
 0x154   : > { %446 = vst.msk [vmem:[%s877_s8 + $0xb0] sm:$0xff] %vm423_vm0, %v413_v57  ;;  %430 = vst.msk [vmem:[%s877_s8 + $0x30] sm:$0xff] %vm423_vm0, %v381_v58 }
 0x157   : > { %v414_v59 = vpop.trf.xlu1  ;;  %v382_v60 = vpop.trf.xlu0 }
 0x158   : > { %447 = vst.msk [vmem:[%s877_s8 + $0xb8] sm:$0xff] %vm423_vm0, %v414_v59  ;;  %431 = vst.msk [vmem:[%s877_s8 + $0x38] sm:$0xff] %vm423_vm0, %v382_v60 }
 0x15b   : > { %v415_v61 = vpop.trf.xlu1  ;;  %v383_v62 = vpop.trf.xlu0 }
 0x15c   : > { %448 = vst.msk [vmem:[%s877_s8 + $0xc0] sm:$0xff] %vm423_vm0, %v415_v61  ;;  %432 = vst.msk [vmem:[%s877_s8 + $0x40] sm:$0xff] %vm423_vm0, %v383_v62 }
 0x15f   : > { %v416_v63 = vpop.trf.xlu1  ;;  %v384_v0 = vpop.trf.xlu0 }
 0x160   : > { %449 = vst.msk [vmem:[%s877_s8 + $0xc8] sm:$0xff] %vm423_vm0, %v416_v63  ;;  %433 = vst.msk [vmem:[%s877_s8 + $0x48] sm:$0xff] %vm423_vm0, %v384_v0 }
 0x163   : > { %v417_v1 = vpop.trf.xlu1  ;;  %v385_v2 = vpop.trf.xlu0 }
 0x164   : > { %450 = vst.msk [vmem:[%s877_s8 + $0xd0] sm:$0xff] %vm423_vm0, %v417_v1  ;;  %434 = vst.msk [vmem:[%s877_s8 + $0x50] sm:$0xff] %vm423_vm0, %v385_v2 }
 0x167   : > { %v418_v3 = vpop.trf.xlu1  ;;  %v386_v4 = vpop.trf.xlu0 }
 0x168   : > { %451 = vst.msk [vmem:[%s877_s8 + $0xd8] sm:$0xff] %vm423_vm0, %v418_v3  ;;  %435 = vst.msk [vmem:[%s877_s8 + $0x58] sm:$0xff] %vm423_vm0, %v386_v4 }
 0x16b   : > { %v419_v5 = vpop.trf.xlu1  ;;  %v387_v6 = vpop.trf.xlu0 }
 0x16c   : > { %452 = vst.msk [vmem:[%s877_s8 + $0xe0] sm:$0xff] %vm423_vm0, %v419_v5  ;;  %436 = vst.msk [vmem:[%s877_s8 + $0x60] sm:$0xff] %vm423_vm0, %v387_v6 }
 0x16f   : > { %v420_v7 = vpop.trf.xlu1  ;;  %v388_v8 = vpop.trf.xlu0 }
 0x170   : > { %453 = vst.msk [vmem:[%s877_s8 + $0xe8] sm:$0xff] %vm423_vm0, %v420_v7  ;;  %437 = vst.msk [vmem:[%s877_s8 + $0x68] sm:$0xff] %vm423_vm0, %v388_v8 }
 0x173   : > { %v421_v9 = vpop.trf.xlu1  ;;  %v389_v10 = vpop.trf.xlu0 }
 0x174   : > { %454 = vst.msk [vmem:[%s877_s8 + $0xf0] sm:$0xff] %vm423_vm0, %v421_v9  ;;  %438 = vst.msk [vmem:[%s877_s8 + $0x70] sm:$0xff] %vm423_vm0, %v389_v10 }
 0x177   : > { %v422_v11 = vpop.trf.xlu1  ;;  %v390_v12 = vpop.trf.xlu0 }
 0x178   : > { %455 = vst.msk [vmem:[%s877_s8 + $0xf8] sm:$0xff] %vm423_vm0, %v422_v11  ;;  %439 = vst.msk [vmem:[%s877_s8 + $0x78] sm:$0xff] %vm423_vm0, %v390_v12 }
 0x179 PF: > { %s16_s17 = sadd.s32 1, %s711_s17   ;;  %s968_s12 = smov %s695_s13 }
 0x17a   : > { %p13_p9 = scmp.ge.s32.totalorder %s16_s17, 4   ;;  %s969_s13 = smov %s699_s14 }
 0x17b   : > { %s970_s14 = smov %s786_s24  ;;  %s971_s15 = smov %s707_s16 }
 0x17c   : > { %s972_s16 = smov %s974_s19  ;;  %15 = sbr.rel (!%p13_p9) target bundleno = 4 (0x4), region = 72 }
 0x183   :  { %486 = vsyncpa [#allocation3], 1 }
 0x184   :  { %488 = vsyncpa [#allocation3 + $0x1], 1 }

</bundles_post_ra>
